<compile_context>
chip_gen: v7x
topology: tpu7x:2x2x1
jax: 0.10.0
libtpu: 0.0.40
codegen_flags: <defaults>
</compile_context>

<pallas_src>
import functools

import jax
import jax.numpy as jnp
from jax.experimental import pallas as pl
from jax.experimental.pallas import tpu as pltpu


def _conv_bn_silu_kernel(p_ref, w_ref, bias_ref, out_ref, acc_ref):
    # p_ref:    (TM, TK) bf16 im2col patch tile
    # w_ref:    (TK, TN) bf16 weight tile (BN scale pre-folded into columns)
    # bias_ref: (1,  TN) fp32 folded BN bias = beta - mean * gamma / sqrt(var+eps)
    # out_ref:  (TM, TN) bf16 output tile
    # acc_ref:  (TM, TN) fp32 accumulator scratch, resident across K steps
    k = pl.program_id(2)
    prod = jnp.dot(p_ref[...], w_ref[...], preferred_element_type=jnp.float32)

    @pl.when(k == 0)
    def _():
        acc_ref[...] = prod          # direct write: no zero-fill on step 0

    @pl.when(k > 0)
    def _():
        acc_ref[...] += prod

    @pl.when(k == pl.num_programs(2) - 1)
    def _():
        y = acc_ref[...] + bias_ref[...]
        # SiLU: y * sigmoid(y); the divide goes to the EUP via approx reciprocal.
        sig = pl.reciprocal(1.0 + jnp.exp(-y), approx=True)
        out_ref[...] = (y * sig).astype(out_ref.dtype)


def _cdiv(a, b):
    return -(-a // b)


def _round_up(x, m):
    return _cdiv(x, m) * m


def _balanced_tile(total, cap, align):
    """Tile <= cap, multiple of `align`, minimizing the padding of `total`."""
    total = _round_up(total, align)
    if total <= cap:
        return total
    steps = _cdiv(total, cap)
    return _round_up(_cdiv(total, steps), align)


def _vmem_capacity_bytes():
    try:
        return int(pltpu.get_tpu_info().vmem_capacity_bytes)
    except Exception:
        return 64 << 20   # conservative default (v7x per-TensorCore VMEM)


def conv_bn_silu(x, weight, gamma, beta, running_mean, running_var,
                 *, stride=1, eps=1e-5):
    """x: (N, C_in, H, W) NCHW. weight: (C_out, C_in, KH, KW) (PyTorch layout)."""
    N, C_in, H, W = x.shape
    C_out, C_in_w, KH, KW = weight.shape
    assert C_in == C_in_w and KH == KW
    # TODO(synk): grouped conv (groups > 1) not implemented; module default groups=1 only.
    k = KH
    assert k % 2 == 1, "padding = k // 2 is 'same' only for odd kernel sizes"
    pad = k // 2
    H_out = (H + 2 * pad - k) // stride + 1
    W_out = (W + 2 * pad - k) // stride + 1
    K = k * k * C_in
    R = N * H_out * W_out                                # flatten batch into rows

    # ---- glue (all bf16): pad + NHWC + im2col ----
    # TODO(synk): replace the host-side im2col (k*k HBM blow-up of activations) with an
    # in-kernel shifted-slab scheme (memory_space=pl.ANY + manual halo DMA) for the
    # mem-bound early layers; also expose an NHWC entry point to drop both transposes
    # when layers are chained.
    xb = x.astype(jnp.bfloat16)
    x_pad = jnp.pad(xb, ((0, 0), (0, 0), (pad, pad), (pad, pad)))
    xp = jnp.transpose(x_pad, (0, 2, 3, 1))              # (N, Hp, Wp, C_in) bf16
    taps = []
    for kh in range(k):
        for kw in range(k):
            taps.append(
                xp[:, kh:kh + stride * (H_out - 1) + 1:stride,
                      kw:kw + stride * (W_out - 1) + 1:stride, :])
    patches = jnp.stack(taps, axis=3).reshape(R, K)      # (R, K) bf16, K = (kh, kw, c_in)

    # Fold BatchNorm2d (eval mode): scale into the weight columns (fp32 math, then
    # bf16 cast), keep only the bias for the epilogue.
    scale = (gamma / jnp.sqrt(running_var + eps)).astype(jnp.float32)
    bias = (beta - running_mean * scale).astype(jnp.float32)
    w_mat = jnp.transpose(weight, (2, 3, 1, 0)).reshape(K, C_out).astype(jnp.float32)
    w_mat = (w_mat * scale[None, :]).astype(jnp.bfloat16)           # (K, C_out) bf16

    # ---- tile selection (lane-dense, VMEM-bounded, per-generation caps) ----
    vmem_cap = _vmem_capacity_bytes()
    big_vmem = vmem_cap >= (100 << 20)        # v5e / v6e: 128 MiB; v7x: 64 MiB per TC
    tm_cap = 1024 if big_vmem else 512
    tn_cap = 512
    tk_cap = 2048                              # prefer full K in one step when it fits

    TN = _balanced_tile(C_out, tn_cap, 128)
    TK = _balanced_tile(K, tk_cap, 128)
    TM = min(tm_cap, _round_up(R, 8))
    C_out_p = _round_up(C_out, TN)
    K_p = _round_up(K, TK)
    # Keep >= 2 parallel output tiles so both v7x TensorCores get work on small layers.
    while TM > 128 and _cdiv(R, TM) * (C_out_p // TN) < 2:
        TM = max(128, _round_up(TM // 2, 8))
    R_p = _round_up(R, TM)

    # zero-pad to tile boundaries (zeros are inert in the matmul; padded rows /
    # channels are sliced off below; padded channels have weight = bias = 0).
    patches = jnp.pad(patches, ((0, R_p - R), (0, K_p - K)))
    w_mat = jnp.pad(w_mat, ((0, K_p - K), (0, C_out_p - C_out)))
    bias = jnp.pad(bias, (0, C_out_p - C_out)).reshape(1, C_out_p)

    grid = (R_p // TM, C_out_p // TN, K_p // TK)

    # Double-buffered bf16 ins/outs + fp32 accumulator, with margin; per-chip cap.
    work_set = (2 * TM * TK * 2        # patches (bf16, double-buffered)
                + 2 * TK * TN * 2      # weights
                + 2 * TM * TN * 2      # bf16 output
                + TM * TN * 4          # fp32 accumulator scratch
                + 2 * TN * 4)          # bias
    vmem_limit = int(min(max(int(work_set * 1.5), 16 << 20),
                         (96 << 20) if big_vmem else (48 << 20)))

    out = pl.pallas_call(
        _conv_bn_silu_kernel,
        out_shape=jax.ShapeDtypeStruct((R_p, C_out_p), jnp.bfloat16),
        grid_spec=pltpu.PrefetchScalarGridSpec(
            num_scalar_prefetch=0,
            grid=grid,
            in_specs=[
                pl.BlockSpec((TM, TK), lambda i, j, kk: (i, kk)),
                pl.BlockSpec((TK, TN), lambda i, j, kk: (kk, j)),
                pl.BlockSpec((1, TN), lambda i, j, kk: (0, j)),
            ],
            out_specs=pl.BlockSpec((TM, TN), lambda i, j, kk: (i, j)),
            scratch_shapes=[pltpu.VMEM((TM, TN), jnp.float32)],
        ),
        compiler_params=pltpu.CompilerParams(
            dimension_semantics=("parallel", "parallel", "arbitrary"),
            vmem_limit_bytes=vmem_limit),
    )(patches, w_mat, bias)

    # strip padding, back to NCHW (bf16 transpose; external interface matches PyTorch).
    out = out[:R, :C_out].reshape(N, H_out, W_out, C_out)
    return jnp.transpose(out, (0, 3, 1, 2))


def _reference(x, weight, gamma, beta, running_mean, running_var, *, stride=1, eps=1e-5):
    k = weight.shape[2]
    pad = k // 2
    y = jax.lax.conv_general_dilated(
        x.astype(jnp.float32), weight.astype(jnp.float32),
        window_strides=(stride, stride),
        padding=((pad, pad), (pad, pad)),
        dimension_numbers=("NCHW", "OIHW", "NCHW"))
    scale = gamma / jnp.sqrt(running_var + eps)
    bias = beta - running_mean * scale
    y = y * scale[None, :, None, None] + bias[None, :, None, None]
    return y * jax.nn.sigmoid(y)


if __name__ == "__main__":
    key = jax.random.PRNGKey(0)
    k_x, k_w, k_g, k_b, k_m, k_v = jax.random.split(key, 6)

    N, C_in, H, W = 2, 4, 16, 16
    C_out, ksize, stride = 8, 3, 1

    x = jax.random.normal(k_x, (N, C_in, H, W), dtype=jnp.float32)
    weight = jax.random.normal(k_w, (C_out, C_in, ksize, ksize), dtype=jnp.float32) * 0.1
    gamma = jax.random.normal(k_g, (C_out,), dtype=jnp.float32) * 0.1 + 1.0
    beta = jax.random.normal(k_b, (C_out,), dtype=jnp.float32) * 0.1
    running_mean = jax.random.normal(k_m, (C_out,), dtype=jnp.float32) * 0.1
    running_var = jax.nn.softplus(jax.random.normal(k_v, (C_out,), dtype=jnp.float32)) + 0.5

    fn = functools.partial(conv_bn_silu, stride=stride)
    out = fn(x, weight, gamma, beta, running_mean, running_var)
    out = jax.block_until_ready(out)

    ref = _reference(x, weight, gamma, beta, running_mean, running_var, stride=stride)
    assert out.shape == (N, C_out, H, W), out.shape
    assert out.dtype == jnp.bfloat16, out.dtype
    # bf16 matmul + bf16 output quantization + approx-reciprocal sigmoid
    # -> loosened tolerance vs the fp32 reference.
    err = float(jnp.max(jnp.abs(out.astype(jnp.float32) - ref)))
    assert err < 7.5e-2, err

    print("KERNEL_OK")
</pallas_src>

<mosaic_0001>
module attributes {stable_mosaic.version = 11 : i64} {
  func.func @_conv_bn_silu_kernel(%arg0: i32, %arg1: i32, %arg2: i32, %arg3: memref<256x128xbf16, #tpu.memory_space<vmem>>, %arg4: memref<128x128xbf16, #tpu.memory_space<vmem>>, %arg5: memref<1x128xf32, #tpu.memory_space<vmem>>, %arg6: memref<256x128xbf16, #tpu.memory_space<vmem>>, %arg7: memref<256x128xf32, #tpu.memory_space<vmem>>) attributes {dimension_semantics = [#tpu.dimension_semantics<parallel>, #tpu.dimension_semantics<parallel>, #tpu.dimension_semantics<arbitrary>], iteration_bounds = array<i64: 2, 1, 1>, scalar_prefetch = 0 : i64, scratch_operands = 1 : i64, tpu.core_type = #tpu.core_type<tc>, window_params = [{transform_indices = @transform_0, window_bounds = array<i64: 256, 128>}, {transform_indices = @transform_1, window_bounds = array<i64: 128, 128>}, {transform_indices = @transform_2, window_bounds = array<i64: 1, 128>}, {transform_indices = @transform_3, window_bounds = array<i64: 256, 128>}]} {
    %c0 = arith.constant 0 : index
    %c0_0 = arith.constant 0 : index
    %0 = vector.load %arg3[%c0, %c0_0] : memref<256x128xbf16, #tpu.memory_space<vmem>>, vector<256x128xbf16>
    %c0_1 = arith.constant 0 : index
    %c0_2 = arith.constant 0 : index
    %1 = vector.load %arg4[%c0_1, %c0_2] : memref<128x128xbf16, #tpu.memory_space<vmem>>, vector<128x128xbf16>
    %cst = arith.constant dense<0.000000e+00> : vector<256x128xf32>
    %2 = tpu.matmul %0, %1, %cst {dimension_numbers = #tpu.dot_dimension_numbers<[1], [0], [0], [1], [0, 0, 1, 1], [], []>} : vector<256x128xbf16>, vector<128x128xbf16>, vector<256x128xf32> -> vector<256x128xf32>
    %c0_i32 = arith.constant 0 : i32
    %3 = arith.cmpi eq, %arg2, %c0_i32 : i32
    %4 = arith.extui %3 : i1 to i32
    %c0_i32_3 = arith.constant 0 : i32
    %5 = arith.cmpi ne, %4, %c0_i32_3 : i32
    scf.if %5 {
      %c0_8 = arith.constant 0 : index
      %c0_9 = arith.constant 0 : index
      %12 = vector.load %arg7[%c0_8, %c0_9] : memref<256x128xf32, #tpu.memory_space<vmem>>, vector<256x128xf32>
      tpu.vector_store %arg7[%c0_8, %c0_9], %2 {strides = array<i32>} : memref<256x128xf32, #tpu.memory_space<vmem>>, vector<256x128xf32>,
    } else {
    }
    %c0_i32_4 = arith.constant 0 : i32
    %6 = arith.cmpi sgt, %arg2, %c0_i32_4 : i32
    %7 = arith.extui %6 : i1 to i32
    %c0_i32_5 = arith.constant 0 : i32
    %8 = arith.cmpi ne, %7, %c0_i32_5 : i32
    scf.if %8 {
      %c0_8 = arith.constant 0 : index
      %c0_9 = arith.constant 0 : index
      %12 = vector.load %arg7[%c0_8, %c0_9] : memref<256x128xf32, #tpu.memory_space<vmem>>, vector<256x128xf32>
      %13 = arith.addf %12, %2 : vector<256x128xf32>
      %c0_10 = arith.constant 0 : index
      %c0_11 = arith.constant 0 : index
      %14 = vector.load %arg7[%c0_10, %c0_11] : memref<256x128xf32, #tpu.memory_space<vmem>>, vector<256x128xf32>
      tpu.vector_store %arg7[%c0_10, %c0_11], %13 {strides = array<i32>} : memref<256x128xf32, #tpu.memory_space<vmem>>, vector<256x128xf32>,
    } else {
    }
    %c0_i32_6 = arith.constant 0 : i32
    %9 = arith.cmpi eq, %arg2, %c0_i32_6 : i32
    %10 = arith.extui %9 : i1 to i32
    %c0_i32_7 = arith.constant 0 : i32
    %11 = arith.cmpi ne, %10, %c0_i32_7 : i32
    scf.if %11 {
      %c0_8 = arith.constant 0 : index
      %c0_9 = arith.constant 0 : index
      %12 = vector.load %arg7[%c0_8, %c0_9] : memref<256x128xf32, #tpu.memory_space<vmem>>, vector<256x128xf32>
      %c0_10 = arith.constant 0 : index
      %c0_11 = arith.constant 0 : index
      %13 = vector.load %arg5[%c0_10, %c0_11] : memref<1x128xf32, #tpu.memory_space<vmem>>, vector<1x128xf32>
      %14 = vector.broadcast %13 : vector<1x128xf32> to vector<256x128xf32>
      %15 = arith.addf %12, %14 : vector<256x128xf32>
      %cst_12 = arith.constant 0.000000e+00 : f32
      %16 = vector.broadcast %cst_12 : f32 to vector<256x128xf32>
      %17 = arith.subf %16, %15 : vector<256x128xf32>
      %18 = math.exp %17 : vector<256x128xf32>
      %cst_13 = arith.constant 1.000000e+00 : f32
      %19 = vector.broadcast %cst_13 : f32 to vector<256x128xf32>
      %20 = arith.addf %19, %18 : vector<256x128xf32>
      %21 = tpu.reciprocal %20 {approx = true} : vector<256x128xf32> -> vector<256x128xf32>
      %22 = arith.mulf %15, %21 : vector<256x128xf32>
      %23 = arith.truncf %22 : vector<256x128xf32> to vector<256x128xbf16>
      %c0_14 = arith.constant 0 : index
      %c0_15 = arith.constant 0 : index
      %24 = vector.load %arg6[%c0_14, %c0_15] : memref<256x128xbf16, #tpu.memory_space<vmem>>, vector<256x128xbf16>
      tpu.vector_store %arg6[%c0_14, %c0_15], %23 {strides = array<i32>} : memref<256x128xbf16, #tpu.memory_space<vmem>>, vector<256x128xbf16>,
    } else {
    }
    return
  }
  func.func @transform_0(%arg0: i32, %arg1: i32, %arg2: i32) -> (i32, i32) {
    %c0_i32 = arith.constant 0 : i32
    return %arg0, %arg2 : i32, i32
  }
  func.func @transform_1(%arg0: i32, %arg1: i32, %arg2: i32) -> (i32, i32) {
    %c0_i32 = arith.constant 0 : i32
    return %arg2, %arg1 : i32, i32
  }
  func.func @transform_2(%arg0: i32, %arg1: i32, %arg2: i32) -> (i32, i32) {
    %c0_i32 = arith.constant 0 : i32
    %c0_i32_0 = arith.constant 0 : i32
    return %c0_i32, %arg1 : i32, i32
  }
  func.func @transform_3(%arg0: i32, %arg1: i32, %arg2: i32) -> (i32, i32) {
    %c0_i32 = arith.constant 0 : i32
    return %arg0, %arg1 : i32, i32
  }
}

</mosaic_0001>

<bundles_post_ra>
// kernel: tpu_custom_call.1
= control target key start
LH: loop header
LB: loop body
LE: loop exit
PB: predicated region body
PF: predicated region fallthrough
CT: control target
= control target key end

     0   :  { %8 = vsyncpa [#allocation4], 0  ;;  %s2456_s0 = inlined_call_operand.hbm [shape: bf16[512,128], index: 0, kind: input, shape index: {}]   ;;  %s2457_s1 = inlined_call_operand.hbm [shape: bf16[128,128], index: 1, kind: input, shape index: {}]   ;;  %s2458_s2 = inlined_call_operand.vmem [shape: f32[1,128], index: 2, kind: input, shape index: {}]   ;;  %s2459_s3 = inlined_call_operand.hbm [shape: bf16[512,128], index: 3, kind: output, shape index: {}]  }
   0x1   :  { %10 = vsyncpa [#allocation4 + $0x1], 0 }
   0x2   :  { %11 = vsyncpa [#allocation7], 0 }
   0x3   :  { %12 = vsyncpa [#allocation5], 0 }
   0x4   :  { %14 = vsyncpa [#allocation5 + $0x1], 0  ;;  %s1995_s12 = smov 0   ;;  %s1997_s13 = smov 0  }
   0x5   :  { %s1999_s14 = smov 0   ;;  %s2001_s15 = smov 0  }
   0x6   :  { %s2003_s16 = smov 0   ;;  %s2005_s17 = smov 0  }
   0x7 LB: > { %s1301_s18 = sadd.s32 4294967295, %s1966_s17   ;;  %s1302_s19 = sadd.s32 4294967294, %s1966_s17   ;;  %s1966_s17 = sphi %s2005_s17, %s20_s17   ;;  %s1962_s16 = sphi %s2003_s16, %s2483_s16   ;;  %s1958_s15 = sphi %s2001_s15, %s2482_s15   ;;  %s1954_s14 = sphi %s1999_s14, %s2481_s14   ;;  %s1950_s13 = sphi %s1997_s13, %s2480_s13   ;;  %s1946_s12 = sphi %s1995_s12, %s2479_s12  }
   0x8   : > { %p61_p0 = scmp.ne.s32.totalorder %s1950_s13, %s1946_s12  ;;  %p2029_p1 = scmp.eq.s32.totalorder %s1301_s18, 0 }
   0x9   : > { %p2033_p2 = scmp.eq.s32.totalorder %s1301_s18, 1  ;;  %p147_p3 = scmp.eq.s32.totalorder %s1302_s19, 1 }
   0xa   : > { %s2464_s20 = scalar_select %p2029_p1, 1, 0 }
   0xb   : > { %s2465_s21 = scalar_select %p2033_p2, 1, 0 }
   0xc   : > { %p2039_p4 = por %p2029_p1, %p61_p0  ;;  %p1303_p5 = scmp.ge.s32.totalorder %s1966_s17, 1 }
   0xd   : > { %p2044_p6 = por %p147_p3, %p61_p0  ;;  %p154_p7 = scmp.lt.s32.totalorder %s1966_s17, 3 }
   0xe   : > { %s2466_s22 = scalar_select %p2039_p4, 1, 0 }
   0xf   : > { %s2467_s23 = scalar_select %p2044_p6, 1, 0 }
  0x10   : > { %p2049_p8 = pnand %p1303_p5, %p154_p7  ;;  %s1968_s25 = smov [#allocation6]  }
  0x11   : > { %s170_s26 = sshll.u32 %s1968_s25, 4  ;;  %s39_s28 = sadd.s32 1, %s1962_s16  ;;  %s171_s26 = int_to_ptr.vmem [resolvable:$true] %s170_s26 }
  0x12   : > { %s2468_s24 = scalar_select %p2049_p8, 1, 0 }
  0x13   : > { %p1601_p9 = pneg %p2049_p8  ;;  %s1822_s4 = scalar_lea.hbm %s2457_s1, 1024 }
  0x14   : > { %p1823_p12 = scmp.ne.s32.totalorder %s2457_s1, %s1822_s4  ;;  %p1829_p5 = scmp.lt.u32.totalorder %s1822_s4, %s2457_s1 }
  0x15   : > { %p2058_p11 = pnand %p1601_p9, %p2029_p1 }
  0x17   : > { %p1824_p13 = pneg %p2058_p11 }
  0x19   : > { %p1825_p0 = pnand %p1824_p13, %p1823_p12 }
  0x1b   : > { %p1826_p3 = pneg %p1825_p0 }
  0x1d   : > { %p1831_p7 = pnand %p1829_p5, %p1826_p3 }
  0x1f   : > { %1834 = shalt.err (!%p1831_p7)
}
  0x20   : > { %s1835_s9 = scalar_lea.vmem %s171_s26, 1024  ;;  %p1843_p1 = scmp.lt.s32.totalorder %s171_s26, %s171_s26 }
  0x21   : > { %p1836_p9 = scmp.ne.s32.totalorder %s171_s26, %s1835_s9  ;;  %p1844_p4 = scmp.lt.s32.totalorder %s1835_s9, %s1835_s9 }
  0x23   : > { %p1838_p10 = pnand %p1836_p9, %p1824_p13  ;;  %p1845_p8 = por %p1844_p4, %p1843_p1 }
  0x25   : > { %p1839_p6 = pneg %p1838_p10 }
  0x27   : > { %p1846_p2 = pnand %p1845_p8, %p1839_p6 }
  0x29   : > { %1849 = shalt.err (!%p1846_p2)
}
  0x2a   : > { %s1969_s10 = smov 64   ;;  %s1970_s11 = smov 4  }
  0x2b   : > { %1604 = dma.hbm_to_vmem [thread:$0]  (!%p2058_p11), %s2457_s1, 1024, %s171_s26, [#allocation7], %s1969_s10, %s1969_s10, %s1970_s11  }
  0x2c   : > { %p41_p1 = scmp.ge.s32.totalorder %s39_s28, 2  ;;  %s48_s25 = sadd.s32 1, %s1954_s14 }
  0x2d   : > { %p55_p2 = scmp.ne.s32.totalorder %s1954_s14, %s1950_s13  ;;  %p56_p4 = scmp.eq.s32.totalorder %s1966_s17, 0 }
  0x2e   : > { %s2485_s28 = smov (%p41_p1, %s39_s28), 0  ;;  %p2471_p8 = scmp.ne.s32.totalorder %s2465_s21, 0 }
  0x2f   : > { %p2088_p6 = por %p56_p4, %p55_p2  ;;  %s43_s30 = ssub.s32 %s1962_s16, %s2485_s28 }
  0x30   : > { %p2094_p10 = por %p2471_p8, %p55_p2  ;;  %p1614_p12 = scmp.lt.s32.totalorder %s1966_s17, 2 }
  0x31   : > { %p46_p11 = scmp.eq.s32.totalorder %s43_s30, 0  ;;  %s190_s26 = sand.u32 1, %s1954_s14  }
  0x32   : > { %s1307_s4 = sshll.u32 %s190_s26, 7  ;;  %s1376_s6 = sshll.u32 %s1962_s16, 11 }
  0x33   : > { %s2103_s5 = scalar_select %p46_p11, %s1954_s14, %s48_s25  }
  0x34   : > { %s2109_s9 = scalar_lea.hbm %s2456_s0, %s1376_s6  ;;  %s194_s21 = scalar_lea.vmem [#allocation3], %s1307_s4 }
  0x35   : > { %s202_s18 = sshll.u32 %s194_s21, 4  ;;  %p2115_p13 = pnand %p1614_p12, %p2088_p6  ;;  %s2111_s18 = int_to_ptr.vmem [resolvable:$true] %s202_s18 }
  0x36   : > { %s2119_s25 = scalar_lea.sflag [#allocation4], %s190_s26  ;;  %s1850_s30 = scalar_lea.hbm %s2109_s9, 2048 }
  0x37   : > { %p1851_p0 = scmp.ne.s32.totalorder %s2109_s9, %s1850_s30  ;;  %p1852_p3 = pneg %p2115_p13 }
  0x38   : > { %s1855_s29 = scalar_lea.hbm %s2456_s0, 4096  ;;  %p1856_p9 = scmp.lt.u32.totalorder %s2109_s9, %s2456_s0 }
  0x39   : > { %p1853_p5 = pnand %p1852_p3, %p1851_p0  ;;  %p1857_p1 = scmp.lt.u32.totalorder %s1855_s29, %s1850_s30 }
  0x3a   : > { %p1859_p4 = scmp.lt.u32.totalorder %s1850_s30, %s2109_s9 }
  0x3b   : > { %p1854_p7 = pneg %p1853_p5  ;;  %p1858_p2 = por %p1857_p1, %p1856_p9 }
  0x3d   : > { %p1860_p6 = por %p1859_p4, %p1858_p2 }
  0x3f   : > { %p1861_p8 = pnand %p1860_p6, %p1854_p7 }
  0x41   : > { %1864 = shalt.err (!%p1861_p8)
}
  0x42   : > { %s1865_s26 = scalar_lea.vmem %s2111_s18, 2048  ;;  %s1971_s21 = smov [#allocation3]  }
  0x43   : > { %p1866_p12 = scmp.ne.s32.totalorder %s2111_s18, %s1865_s26  ;;  %s1870_s4 = sshll.u32 %s1971_s21, 4  ;;  %s1871_s4 = int_to_ptr.vmem [resolvable:$false] %s1870_s4 }
  0x44   : > { %s1872_s6 = scalar_lea.vmem %s1871_s4, 4096  ;;  %p1873_p5 = scmp.lt.s32.totalorder %s2111_s18, %s1871_s4 }
  0x45   : > { %p1868_p11 = pnand %p1866_p12, %p1852_p3  ;;  %p1874_p9 = scmp.lt.s32.totalorder %s1872_s6, %s1865_s26 }
  0x47   : > { %p1869_p0 = pneg %p1868_p11  ;;  %p1875_p1 = por %p1874_p9, %p1873_p5 }
  0x49   : > { %p1876_p2 = pnand %p1875_p1, %p1869_p0 }
  0x4b   : > { %1879 = shalt.err (!%p1876_p2)
}
  0x4c   : > { %1608 = dma.hbm_to_vmem [thread:$0]  (!%p2115_p13), %s2109_s9, 2048, %s2111_s18, %s2119_s25, %s1969_s10, %s1969_s10, %s1970_s11  }
  0x4d   : > { %p2474_p3 = scmp.ne.s32.totalorder %s2468_s24, 0 }
  0x4e   : > { %s2153_s30 = sand.u32 (!%p2474_p3), 1, %s1950_s13   ;;  %p2475_p7 = scmp.ne.s32.totalorder (!%p2474_p3), %s2466_s22, 0 }
  0x4f   : > { %214 = sbr.rel (%p2474_p3) target bundleno = 441 (0x1b9), region = 32  ;;  %s1311_s29 = sshll.u32 (!%p2474_p3), %s2153_s30, 7 }
  0x50   : > { %s217_s7 = scalar_lea.sflag (!%p2474_p3), [#allocation4], %s2153_s30  ;;  %s2159_s19 = scalar_lea.vmem (!%p2474_p3), [#allocation3], %s1311_s29 }
  0x56   : > { %1933 = dma.done.wait (%p2475_p7), %s217_s7, 2048  }
  0x57   : > { %1935 = vsyncadd (%p2475_p7), %s217_s7, 4294965248  ;;  %p2476_p13 = scmp.ne.s32.totalorder %s2464_s20, 0 }
  0x59   : > { %1937 = dma.done.wait (%p2476_p13), [#allocation7], 1024  }
  0x5a   : > { %1939 = vsyncadd (%p2476_p13), [#allocation7], 4294966272  ;;  %v1670_v0 = vld [vmem:[#allocation6] sm:$0xff]   ;;  %v1671_v1 = vld [vmem:[#allocation6 + $0x8] sm:$0xff]   ;;  %s2321_s24 = scalar_lea.vmem [#allocation8], %s1311_s29  ;;  %s1409_s10 = sshll.u32 %s1958_s15, 11 }
  0x5b   : > { %1529 = vmatprep.subr.bf16.mxu0 %v1670_v0  ;;  %1577 = vmatprep.subr.bf16.mxu1 %v1670_v0  ;;  %v1672_v2 = vld [vmem:[#allocation6 + $0x10] sm:$0xff]   ;;  %v1673_v3 = vld [vmem:[#allocation6 + $0x18] sm:$0xff]   ;;  %v1678_v4 = vld [vmem:[%s2159_s19] sm:$0xff]   ;;  %s1187_s11 = sshll.u32 %s2321_s24, 4  ;;  %s2402_s15 = scalar_lea.hbm %s2459_s3, %s1409_s10  ;;  %s2404_s11 = int_to_ptr.vmem [resolvable:$true] %s1187_s11 }
  0x5c   : > { %1530 = vmatpush3.bf16.msra.mxu0 %v1670_v0  ;;  %1585 = vmatpush3.bf16.msra.mxu1 %v1670_v0  ;;  %v1679_v5 = vld [vmem:[%s2159_s19 + $0x40] sm:$0xff]   ;;  %v1675_v7 = vld [vmem:[#allocation6 + $0x28] sm:$0xff]   ;;  %v1676_v8 = vld [vmem:[#allocation6 + $0x30] sm:$0xff]   ;;  %s1173_s25 = scalar_lea.sflag [#allocation5], %s2153_s30  ;;  %s1880_s8 = scalar_lea.vmem %s2404_s11, 2048 }
  0x5d   : > { %1531 = vmatprep.subr.bf16.mxu0 %v1671_v1  ;;  %1578 = vmatprep.subr.bf16.mxu1 %v1671_v1  ;;  %v1674_v6 = vld [vmem:[#allocation6 + $0x20] sm:$0xff]   ;;  %v1677_v9 = vld [vmem:[#allocation6 + $0x38] sm:$0xff]   ;;  %v1680_v10 = vld [vmem:[%s2159_s19 + $0x8] sm:$0xff]   ;;  %p1881_p4 = scmp.ne.s32.totalorder %s2404_s11, %s1880_s8  ;;  %s1972_s26 = smov [#allocation8]  }
  0x5e   : > { %1545 = vmatprep.mubr.bf16.mxu0 %v1678_v4  ;;  %1561 = vmatprep.mubr.bf16.mxu1 %v1679_v5  ;;  %v1681_v11 = vld [vmem:[%s2159_s19 + $0x48] sm:$0xff]   ;;  %v1682_v12 = vld [vmem:[%s2159_s19 + $0x10] sm:$0xff]   ;;  %v1684_v14 = vld [vmem:[%s2159_s19 + $0x18] sm:$0xff]   ;;  %s1884_s21 = sshll.u32 %s1972_s26, 4  ;;  %s1885_s21 = int_to_ptr.vmem [resolvable:$false] %s1884_s21 }
  0x5f   : > { %v1683_v13 = vld [vmem:[%s2159_s19 + $0x50] sm:$0xff]   ;;  %v1685_v15 = vld [vmem:[%s2159_s19 + $0x58] sm:$0xff]   ;;  %v1686_v16 = vld [vmem:[%s2159_s19 + $0x20] sm:$0xff]   ;;  %p1882_p6 = pnand %p1881_p4, %p2094_p10  ;;  %s1886_s4 = scalar_lea.vmem %s1885_s21, 4096 }
  0x60   : > { %1532 = vmatpush3.bf16.msra.mxu0 %v1671_v1  ;;  %1586 = vmatpush3.bf16.msra.mxu1 %v1671_v1  ;;  %v1687_v17 = vld [vmem:[%s2159_s19 + $0x60] sm:$0xff]   ;;  %v1688_v18 = vld [vmem:[%s2159_s19 + $0x28] sm:$0xff]   ;;  %v1690_v20 = vld [vmem:[%s2159_s19 + $0x30] sm:$0xff]   ;;  %p1887_p12 = scmp.lt.s32.totalorder %s2404_s11, %s1885_s21  ;;  %p1888_p11 = scmp.lt.s32.totalorder %s1886_s4, %s1880_s8 }
  0x61   : > { %1533 = vmatprep.subr.bf16.mxu0 %v1672_v2  ;;  %1579 = vmatprep.subr.bf16.mxu1 %v1672_v2  ;;  %v1689_v19 = vld [vmem:[%s2159_s19 + $0x68] sm:$0xff]   ;;  %v1691_v21 = vld [vmem:[%s2159_s19 + $0x70] sm:$0xff]   ;;  %v1692_v22 = vld [vmem:[%s2159_s19 + $0x38] sm:$0xff]   ;;  %p1883_p8 = pneg %p1882_p6 }
  0x62   : > { %v1693_v23 = vld [vmem:[%s2159_s19 + $0x78] sm:$0xff]   ;;  %v2188_v24 = vld [vmem:[%s2458_s2] ss:$0 sm:$0xff]  ;;  %p1889_p0 = por %p1888_p11, %p1887_p12 }
  0x64   : > { %1534 = vmatpush3.bf16.msra.mxu0 %v1672_v2  ;;  %1587 = vmatpush3.bf16.msra.mxu1 %v1672_v2  ;;  %p1890_p5 = pnand %p1889_p0, %p1883_p8 }
  0x65   : > { %1535 = vmatprep.subr.bf16.mxu0 %v1673_v3  ;;  %1580 = vmatprep.subr.bf16.mxu1 %v1673_v3 }
  0x68   : > { %1536 = vmatpush3.bf16.msra.mxu0 %v1673_v3  ;;  %1588 = vmatpush3.bf16.msra.mxu1 %v1673_v3 }
  0x69   : > { %1537 = vmatprep.subr.bf16.mxu0 %v1674_v6  ;;  %1581 = vmatprep.subr.bf16.mxu1 %v1674_v6 }
  0x6c   : > { %1538 = vmatpush3.bf16.msra.mxu0 %v1674_v6  ;;  %1589 = vmatpush3.bf16.msra.mxu1 %v1674_v6 }
  0x6d   : > { %1539 = vmatprep.subr.bf16.mxu0 %v1675_v7  ;;  %1582 = vmatprep.subr.bf16.mxu1 %v1675_v7 }
  0x70   : > { %1540 = vmatpush3.bf16.msra.mxu0 %v1675_v7  ;;  %1590 = vmatpush3.bf16.msra.mxu1 %v1675_v7 }
  0x71   : > { %1541 = vmatprep.subr.bf16.mxu0 %v1676_v8  ;;  %1583 = vmatprep.subr.bf16.mxu1 %v1676_v8 }
  0x74   : > { %1542 = vmatpush3.bf16.msra.mxu0 %v1676_v8  ;;  %1591 = vmatpush3.bf16.msra.mxu1 %v1676_v8 }
  0x75   : > { %1543 = vmatprep.subr.bf16.mxu0 %v1677_v9  ;;  %1584 = vmatprep.subr.bf16.mxu1 %v1677_v9 }
  0x78   : > { %1544 = vmatpush3.bf16.msra.mxu0 %v1677_v9  ;;  %1592 = vmatpush3.bf16.msra.mxu1 %v1677_v9 }
  0x7b   : > { %1546 = vmatmul.mubr.bf16.vlgmr.msra.gmra.mrb[0].mxu0 %v1680_v10  ;;  %1562 = vmatmul.mubr.bf16.vlgmr.msra.gmra.mrb[0].mxu1 %v1681_v11 }
  0x7c   : > { %1549 = vmatprep.mubr.bf16.mxu0 %v1682_v12  ;;  %1565 = vmatprep.mubr.bf16.mxu1 %v1683_v13 }
  0x83   : > { %1550 = vmatmul.mubr.bf16.gmra.mrb[4].mxu0 %v1684_v14  ;;  %1566 = vmatmul.mubr.bf16.gmra.mrb[4].mxu1 %v1685_v15 }
  0x84   : > { %1553 = vmatprep.mubr.bf16.mxu0 %v1686_v16  ;;  %1569 = vmatprep.mubr.bf16.mxu1 %v1687_v17 }
  0x8b   : > { %1554 = vmatmul.mubr.bf16.gmra.mrb[8].mxu0 %v1688_v18  ;;  %1570 = vmatmul.mubr.bf16.gmra.mrb[8].mxu1 %v1689_v19 }
  0x8c   : > { %1557 = vmatprep.mubr.bf16.mxu0 %v1690_v20  ;;  %1573 = vmatprep.mubr.bf16.mxu1 %v1691_v21 }
  0x93   : > { %1558 = vmatmul.mubr.bf16.gmra.mrb[12].mxu0 %v1692_v22  ;;  %1574 = vmatmul.mubr.bf16.gmra.mrb[12].mxu1 %v1693_v23 }
 0x14e   : > { %v1547_v25 = vpop.f32.mrb[0].mxu0  ;;  %v1563_v26 = vpop.f32.mrb[0].mxu1 }
 0x14f   : > { %v2191_v27 = vadd.f32 %v1547_v25, %v2188_v24  ;;  %v2194_v28 = vadd.f32 %v1563_v26, %v2188_v24  ;;  %v483_v29 = vpop.f32.mrb[1].mxu0  ;;  %v547_v30 = vpop.f32.mrb[1].mxu1 }
 0x150   : > { %v2197_v31 = vadd.f32 %v2188_v24, %v483_v29  ;;  %v2200_v32 = vadd.f32 %v2188_v24, %v547_v30  ;;  %v1548_v33 = vpop.f32.mrb[2].mxu0  ;;  %v1564_v34 = vpop.f32.mrb[2].mxu1 }
 0x151   : > { %v822_v35 = vsub.f32 0.0, %v2191_v27  ;;  %v838_v36 = vsub.f32 0.0, %v2194_v28  ;;  %v2205_v37 = vadd.f32 %v1548_v33, %v2188_v24  ;;  %v2208_v38 = vadd.f32 %v1564_v34, %v2188_v24  ;;  %v486_v39 = vpop.f32.mrb[3].mxu0  ;;  %v550_v40 = vpop.f32.mrb[3].mxu1 }
 0x152   : > { %v820_v41 = vsub.f32 0.0, %v2197_v31  ;;  %v836_v42 = vsub.f32 0.0, %v2200_v32  ;;  %v2213_v43 = vadd.f32 %v2188_v24, %v486_v39  ;;  %v2216_v44 = vadd.f32 %v2188_v24, %v550_v40 }
 0x153   : > { %v856_v45 = vmul.f32 1.442695, %v822_v35  ;;  %v888_v46 = vmul.f32 1.442695, %v838_v36  ;;  %v823_v47 = vsub.f32 0.0, %v2205_v37  ;;  %v839_v48 = vsub.f32 0.0, %v2208_v38 }
 0x154   : > { %v852_v49 = vmul.f32 1.442695, %v820_v41  ;;  %v884_v50 = vmul.f32 1.442695, %v836_v42  ;;  %v821_v51 = vsub.f32 0.0, %v2213_v43  ;;  %v837_v52 = vsub.f32 0.0, %v2216_v44 }
 0x155   : > { %1694 = vpow2.f32 %v856_v45  ;;  %v858_v53 = vmul.f32 1.442695, %v823_v47  ;;  %v890_v54 = vmul.f32 1.442695, %v839_v48 }
 0x156   : > { %1696 = vpow2.f32 %v888_v46  ;;  %v1551_v55 = vpop.f32.mrb[4].mxu0  ;;  %v1567_v56 = vpop.f32.mrb[4].mxu1  ;;  %v854_v57 = vmul.f32 1.442695, %v821_v51  ;;  %v886_v62 = vmul.f32 1.442695, %v837_v52 }
 0x157   : > { %1698 = vpow2.f32 %v852_v49  ;;  %v2223_v58 = vadd.f32 %v1551_v55, %v2188_v24  ;;  %v2226_v59 = vadd.f32 %v1567_v56, %v2188_v24  ;;  %v499_v60 = vpop.f32.mrb[5].mxu0  ;;  %v563_v61 = vpop.f32.mrb[5].mxu1 }
 0x158   : > { %1700 = vpow2.f32 %v884_v50  ;;  %v2229_v63 = vadd.f32 %v2188_v24, %v499_v60  ;;  %v2232_v0 = vadd.f32 %v2188_v24, %v563_v61  ;;  %v1552_v1 = vpop.f32.mrb[6].mxu0  ;;  %v1568_v2 = vpop.f32.mrb[6].mxu1 }
 0x159   : > { %1702 = vpow2.f32 %v858_v53  ;;  %v826_v3 = vsub.f32 0.0, %v2223_v58  ;;  %v842_v4 = vsub.f32 0.0, %v2226_v59  ;;  %v2237_v5 = vadd.f32 %v1552_v1, %v2188_v24  ;;  %v502_v6 = vpop.f32.mrb[7].mxu0  ;;  %v566_v7 = vpop.f32.mrb[7].mxu1 }
 0x15a   : > { %1704 = vpow2.f32 %v890_v54  ;;  %v824_v8 = vsub.f32 0.0, %v2229_v63  ;;  %v840_v9 = vsub.f32 0.0, %v2232_v0  ;;  %v2242_v10 = vadd.f32 %v1568_v2, %v2188_v24 }
 0x15b   : > { %1706 = vpow2.f32 %v854_v57  ;;  %v864_v11 = vmul.f32 1.442695, %v826_v3  ;;  %v896_v12 = vmul.f32 1.442695, %v842_v4  ;;  %v827_v13 = vsub.f32 0.0, %v2237_v5 }
 0x15c   : > { %1708 = vpow2.f32 %v886_v62  ;;  %v860_v14 = vmul.f32 1.442695, %v824_v8  ;;  %v892_v15 = vmul.f32 1.442695, %v840_v9  ;;  %v843_v20 = vsub.f32 0.0, %v2242_v10 }
 0x15d   : > { %1710 = vpow2.f32 %v864_v11  ;;  %v866_v16 = vmul.f32 1.442695, %v827_v13  ;;  %v2247_v26 = vadd.f32 %v2188_v24, %v502_v6  ;;  %v2250_v29 = vadd.f32 %v2188_v24, %v566_v7 }
 0x15e   : > { %1712 = vpow2.f32 %v896_v12  ;;  %v1555_v17 = vpop.f32.mrb[8].mxu0  ;;  %v1571_v18 = vpop.f32.mrb[8].mxu1  ;;  %v2252_v46 = vmul.f32 1.442695, %v843_v20 }
 0x15f   : > { %v1695_v19 = vpop.eup %1694  ;;  %1714 = vpow2.f32 %v860_v14  ;;  %v515_v21 = vpop.f32.mrb[9].mxu0  ;;  %v825_v49 = vsub.f32 0.0, %v2247_v26  ;;  %v841_v50 = vsub.f32 0.0, %v2250_v29  ;;  %v2257_v53 = vadd.f32 %v1555_v17, %v2188_v24 }
 0x160   : > { %v579_v22 = vpop.f32.mrb[9].mxu1  ;;  %v1697_v23 = vpop.eup %1696  ;;  %v918_v25 = vadd.f32 1.0, %v1695_v19  ;;  %1716 = vpow2.f32 %v892_v15  ;;  %v2260_v54 = vadd.f32 %v1571_v18, %v2188_v24  ;;  %v2263_v57 = vadd.f32 %v2188_v24, %v515_v21 }
 0x161   : > { %v1556_v30 = vpop.f32.mrb[10].mxu0  ;;  %v1572_v33 = vpop.f32.mrb[10].mxu1  ;;  %v934_v35 = vadd.f32 1.0, %v1697_v23  ;;  %1718 = vpow2.f32 %v866_v16  ;;  %v2266_v60 = vadd.f32 %v2188_v24, %v579_v22  ;;  %v862_v11 = vmul.f32 1.442695, %v825_v49 }
 0x162   : > { %v1699_v34 = vpop.eup %1698  ;;  %v518_v36 = vpop.f32.mrb[11].mxu0  ;;  %1720 = vrcp.f32 %v918_v25  ;;  %v2269_v3 = vadd.f32 %v1556_v30, %v2188_v24  ;;  %v2272_v4 = vadd.f32 %v1572_v33, %v2188_v24  ;;  %v830_v17 = vsub.f32 0.0, %v2257_v53 }
 0x163   : > { %v1701_v39 = vpop.eup %1700  ;;  %v916_v40 = vadd.f32 1.0, %v1699_v34  ;;  %v582_v41 = vpop.f32.mrb[11].mxu1  ;;  %1722 = vrcp.f32 %v934_v35  ;;  %v2279_v12 = vadd.f32 %v2188_v24, %v518_v36  ;;  %v846_v18 = vsub.f32 0.0, %v2260_v54 }
 0x164   : > { %v1703_v42 = vpop.eup %1702  ;;  %v932_v45 = vadd.f32 1.0, %v1701_v39  ;;  %v828_v23 = vsub.f32 0.0, %v2263_v57  ;;  %v844_v25 = vsub.f32 0.0, %v2266_v60  ;;  %v831_v34 = vsub.f32 0.0, %v2269_v3 }
 0x165   : > { %v1705_v47 = vpop.eup %1704  ;;  %1724 = vrcp.f32 %v916_v40  ;;  %v919_v48 = vadd.f32 1.0, %v1703_v42  ;;  %v847_v35 = vsub.f32 0.0, %v2272_v4  ;;  %v829_v40 = vsub.f32 0.0, %v2279_v12 }
 0x166   : > { %v1707_v51 = vpop.eup %1706  ;;  %1726 = vrcp.f32 %v932_v45  ;;  %v935_v52 = vadd.f32 1.0, %v1705_v47  ;;  %v1559_v61 = vpop.f32.mrb[12].mxu0  ;;  %v2297_v42 = vadd.f32 %v2188_v24, %v582_v41  ;;  %v894_v47 = vmul.f32 1.442695, %v841_v50 }
 0x167   : > { %v1709_v55 = vpop.eup %1708  ;;  %1728 = vrcp.f32 %v919_v48  ;;  %v917_v56 = vadd.f32 1.0, %v1707_v51  ;;  %v1575_v62 = vpop.f32.mrb[12].mxu1  ;;  %v872_v48 = vmul.f32 1.442695, %v830_v17  ;;  %v904_v51 = vmul.f32 1.442695, %v846_v18 }
 0x168   : > { %v1711_v1 = vpop.eup %1710  ;;  %1730 = vrcp.f32 %v935_v52  ;;  %v933_v2 = vadd.f32 1.0, %v1709_v55  ;;  %v2274_v6 = vpop.f32.mrb[13].mxu0  ;;  %v2300_v52 = vadd.f32 %v1559_v61, %v2188_v24  ;;  %v2303_v55 = vadd.f32 %v1575_v62, %v2188_v24 }
 0x169   : > { %v2276_v7 = vpop.f32.mrb[13].mxu1  ;;  %v1713_v8 = vpop.eup %1712  ;;  %1732 = vrcp.f32 %v917_v56  ;;  %v922_v9 = vadd.f32 1.0, %v1711_v1  ;;  %v868_v1 = vmul.f32 1.442695, %v828_v23  ;;  %v874_v41 = vmul.f32 1.442695, %v831_v34 }
 0x16a   : > { %v2281_v13 = vpop.f32.mrb[14].mxu0  ;;  %v2283_v14 = vpop.f32.mrb[14].mxu1  ;;  %1734 = vrcp.f32 %v933_v2  ;;  %v938_v16 = vadd.f32 1.0, %v1713_v8  ;;  %v900_v2 = vmul.f32 1.442695, %v844_v25 }
 0x16b   : > { %v1715_v15 = vpop.eup %1714  ;;  %v2287_v19 = vpop.f32.mrb[15].mxu0  ;;  %1736 = vrcp.f32 %v922_v9  ;;  %v906_v9 = vmul.f32 1.442695, %v847_v35  ;;  %v870_v50 = vmul.f32 1.442695, %v829_v40 }
 0x16c   : > { %v2289_v20 = vpop.f32.mrb[15].mxu1  ;;  %v1717_v21 = vpop.eup %1716  ;;  %v920_v22 = vadd.f32 1.0, %v1715_v15  ;;  %1738 = vrcp.f32 %v938_v16  ;;  %v845_v15 = vsub.f32 0.0, %v2297_v42 }
 0x16d   : > { %v1719_v30 = vpop.eup %1718  ;;  %v936_v33 = vadd.f32 1.0, %v1717_v21  ;;  %v834_v21 = vsub.f32 0.0, %v2300_v52 }
 0x16e   : > { %v1721_v36 = vpop.eup %1720  ;;  %1740 = vrcp.f32 %v920_v22  ;;  %v923_v39 = vadd.f32 1.0, %v1719_v30 }
 0x16f   : > { %v1723_v45 = vpop.eup %1722  ;;  %1742 = vrcp.f32 %v936_v33  ;;  %v982_v17 = vmul.f32 %v1721_v36, %v2191_v27 }
 0x170   : > { %v1725_v49 = vpop.eup %1724  ;;  %1744 = vrcp.f32 %v923_v39  ;;  %v998_v61 = vmul.f32 %v1723_v45, %v2194_v28 }
 0x171   : > { %v1727_v56 = vpop.eup %1726  ;;  %1746 = vpow2.f32 %v2252_v46  ;;  %v980_v23 = vmul.f32 %v1725_v49, %v2197_v31 }
 0x172   : > { %v1729_v8 = vpop.eup %1728  ;;  %1748 = vpow2.f32 %v862_v11  ;;  %v850_v11 = vsub.f32 0.0, %v2303_v55 }
 0x173   : > { %v1731_v16 = vpop.eup %1730  ;;  %v983_v62 = vmul.f32 %v1729_v8, %v2205_v37  ;;  %1750 = vpow2.f32 %v894_v47  ;;  %v996_v37 = vmul.f32 %v1727_v56, %v2200_v32 }
 0x174   : > { %v1733_v18 = vpop.eup %1732  ;;  %v999_v46 = vmul.f32 %v1731_v16, %v2208_v38  ;;  %1752 = vpow2.f32 %v872_v48  ;;  %v912_v36 = vmul.f32 1.442695, %v850_v11  ;;  %v2353_v11 = vadd.f32 %v2188_v24, %v2287_v19 }
 0x175   : > { %v1735_v22 = vpop.eup %1734  ;;  %v1418_v25 = vpack.c.bf16 %v983_v62, %v982_v17  ;;  %v981_v27 = vmul.f32 %v1733_v18, %v2213_v43  ;;  %1754 = vpow2.f32 %v904_v51  ;;  %v902_v43 = vmul.f32 1.442695, %v845_v15 }
 0x176   : > { %v1737_v28 = vpop.eup %1736  ;;  %v1458_v30 = vpack.c.bf16 %v999_v46, %v998_v61  ;;  %v997_v33 = vmul.f32 %v1735_v22, %v2216_v44  ;;  %1756 = vpow2.f32 %v868_v1  ;;  %v880_v44 = vmul.f32 1.442695, %v834_v21 }
 0x177   : > { %v2317_v38 = vpop.eup %1738  ;;  %1490 = vst [vmem:[%s2321_s24 + $0x8] sm:$0xff] %v1418_v25   ;;  %v1413_v31 = vpack.c.bf16 %v981_v27, %v980_v23  ;;  %1758 = vpow2.f32 %v900_v2  ;;  %v986_v45 = vmul.f32 %v1737_v28, %v2223_v58  ;;  %v2336_v58 = vadd.f32 %v2188_v24, %v2274_v6 }
 0x178   : > { %v2324_v34 = vpop.eup %1740  ;;  %1498 = vst [vmem:[%s2321_s24 + $0x48] sm:$0xff] %v1458_v30   ;;  %v1453_v32 = vpack.c.bf16 %v997_v33, %v996_v37  ;;  %1760 = vpow2.f32 %v874_v41  ;;  %v2340_v15 = vadd.f32 %v2188_v24, %v2276_v7  ;;  %v2344_v61 = vadd.f32 %v2281_v13, %v2188_v24 }
 0x179   : > { %v2327_v35 = vpop.eup %1742  ;;  %1414 = vst [vmem:[%s2321_s24] sm:$0xff] %v1413_v31   ;;  %1762 = vpow2.f32 %v906_v9  ;;  %v2348_v6 = vadd.f32 %v2283_v14, %v2188_v24  ;;  %v832_v7 = vsub.f32 0.0, %v2336_v58  ;;  %v2358_v25 = vadd.f32 %v2188_v24, %v2289_v20 }
 0x17a   : > { %v1745_v39 = vpop.eup %1744  ;;  %1497 = vst [vmem:[%s2321_s24 + $0x40] sm:$0xff] %v1453_v32   ;;  %1764 = vpow2.f32 %v870_v50  ;;  %v848_v23 = vsub.f32 0.0, %v2340_v15  ;;  %v835_v28 = vsub.f32 0.0, %v2344_v61 }
 0x17b   : > { %v1747_v40 = vpop.eup %1746  ;;  %v987_v47 = vmul.f32 %v1745_v39, %v2237_v5  ;;  %1766 = vpow2.f32 %v902_v43  ;;  %v851_v19 = vsub.f32 0.0, %v2348_v6  ;;  %v876_v31 = vmul.f32 1.442695, %v832_v7 }
 0x17c   : > { %v1749_v48 = vpop.eup %1748  ;;  %v939_v49 = vadd.f32 1.0, %v1747_v40  ;;  %1768 = vpow2.f32 %v880_v44  ;;  %v833_v43 = vsub.f32 0.0, %v2353_v11  ;;  %v908_v44 = vmul.f32 1.442695, %v848_v23 }
 0x17d   : > { %v1751_v51 = vpop.eup %1750  ;;  %v1428_v56 = vpack.c.bf16 %v987_v47, %v986_v45  ;;  %v921_v1 = vadd.f32 1.0, %v1749_v48  ;;  %1770 = vpow2.f32 %v912_v36  ;;  %v849_v24 = vsub.f32 0.0, %v2358_v25 }
 0x17e   : > { %v1753_v2 = vpop.eup %1752  ;;  %1772 = vrcp.f32 %v939_v49  ;;  %v937_v41 = vadd.f32 1.0, %v1751_v51  ;;  %v1002_v36 = vmul.f32 %v2317_v38, %v2226_v59  ;;  %v882_v40 = vmul.f32 1.442695, %v835_v28 }
 0x17f   : > { %v1755_v8 = vpop.eup %1754  ;;  %1492 = vst [vmem:[%s2321_s24 + $0x18] sm:$0xff] %v1428_v56   ;;  %1774 = vrcp.f32 %v921_v1  ;;  %v926_v9 = vadd.f32 1.0, %v1753_v2  ;;  %v984_v47 = vmul.f32 %v2324_v34, %v2229_v63  ;;  %v1000_v48 = vmul.f32 %v2327_v35, %v2232_v0 }
 0x180   : > { %v1757_v5 = vpop.eup %1756  ;;  %1776 = vrcp.f32 %v937_v41  ;;  %v942_v50 = vadd.f32 1.0, %v1755_v8  ;;  %v914_v51 = vmul.f32 1.442695, %v851_v19  ;;  %v910_v41 = vmul.f32 1.442695, %v849_v24 }
 0x181   : > { %v1759_v16 = vpop.eup %1758  ;;  %1778 = vrcp.f32 %v926_v9  ;;  %v924_v17 = vadd.f32 1.0, %v1757_v5 }
 0x182   : > { %v1761_v62 = vpop.eup %1760  ;;  %1780 = vrcp.f32 %v942_v50  ;;  %v940_v18 = vadd.f32 1.0, %v1759_v16 }
 0x183   : > { %v1763_v46 = vpop.eup %1762  ;;  %1782 = vrcp.f32 %v924_v17  ;;  %v927_v21 = vadd.f32 1.0, %v1761_v62 }
 0x184   : > { %v1765_v22 = vpop.eup %1764  ;;  %1784 = vrcp.f32 %v940_v18  ;;  %v943_v13 = vadd.f32 1.0, %v1763_v46 }
 0x185   : > { %v1767_v14 = vpop.eup %1766  ;;  %1786 = vrcp.f32 %v927_v21  ;;  %v925_v27 = vadd.f32 1.0, %v1765_v22 }
 0x186   : > { %v1769_v37 = vpop.eup %1768  ;;  %1788 = vrcp.f32 %v943_v13  ;;  %v941_v30 = vadd.f32 1.0, %v1767_v14 }
 0x187   : > { %v1771_v33 = vpop.eup %1770  ;;  %1790 = vrcp.f32 %v925_v27  ;;  %v930_v46 = vadd.f32 1.0, %v1769_v37 }
 0x188   : > { %v1773_v32 = vpop.eup %1772  ;;  %1792 = vrcp.f32 %v941_v30  ;;  %v946_v7 = vadd.f32 1.0, %v1771_v33 }
 0x189   : > { %v1775_v20 = vpop.eup %1774  ;;  %v1003_v39 = vmul.f32 %v1773_v32, %v2242_v10  ;;  %1794 = vpow2.f32 %v876_v31  ;;  %v878_v10 = vmul.f32 1.442695, %v833_v43 }
 0x18a   : > { %v1777_v45 = vpop.eup %1776  ;;  %v985_v49 = vmul.f32 %v1775_v20, %v2247_v26  ;;  %1796 = vpow2.f32 %v908_v44 }
 0x18b   : > { %v1779_v56 = vpop.eup %1778  ;;  %v1468_v1 = vpack.c.bf16 %v1003_v39, %v1002_v36  ;;  %v1001_v59 = vmul.f32 %v1777_v45, %v2250_v29  ;;  %1798 = vpow2.f32 %v882_v40 }
 0x18c   : > { %v1781_v38 = vpop.eup %1780  ;;  %v1423_v2 = vpack.c.bf16 %v985_v49, %v984_v47  ;;  %1800 = vpow2.f32 %v914_v51  ;;  %v990_v29 = vmul.f32 %v1779_v56, %v2257_v53 }
 0x18d   : > { %v1783_v8 = vpop.eup %1782  ;;  %1500 = vst [vmem:[%s2321_s24 + $0x58] sm:$0xff] %v1468_v1   ;;  %v1463_v63 = vpack.c.bf16 %v1001_v59, %v1000_v48  ;;  %1802 = vpow2.f32 %v878_v10  ;;  %v1006_v5 = vmul.f32 %v1781_v38, %v2260_v54 }
 0x18e   : > { %v1785_v0 = vpop.eup %1784  ;;  %1491 = vst [vmem:[%s2321_s24 + $0x10] sm:$0xff] %v1423_v2   ;;  %1804 = vpow2.f32 %v910_v41  ;;  %v988_v17 = vmul.f32 %v1783_v8, %v2263_v57 }
 0x18f   : > { %v1787_v26 = vpop.eup %1786  ;;  %1499 = vst [vmem:[%s2321_s24 + $0x50] sm:$0xff] %v1463_v63   ;;  %v1004_v53 = vmul.f32 %v1785_v0, %v2266_v60  ;;  %1806 = vrcp.f32 %v930_v46 }
 0x190   : > { %v1789_v34 = vpop.eup %1788  ;;  %v991_v35 = vmul.f32 %v1787_v26, %v2269_v3  ;;  %1808 = vrcp.f32 %v946_v7 }
 0x191   : > { %v1791_v9 = vpop.eup %1790  ;;  %v1007_v50 = vmul.f32 %v1789_v34, %v2272_v4 }
 0x192   : > { %v1793_v16 = vpop.eup %1792  ;;  %v1438_v62 = vpack.c.bf16 %v991_v35, %v990_v29  ;;  %v989_v18 = vmul.f32 %v1791_v9, %v2279_v12 }
 0x193   : > { %v1478_v21 = vpack.c.bf16 %v1007_v50, %v1006_v5  ;;  %v1005_v3 = vmul.f32 %v1793_v16, %v2297_v42  ;;  %v1795_v54 = vpop.eup %1794 }
 0x194   : > { %1494 = vst [vmem:[%s2321_s24 + $0x28] sm:$0xff] %v1438_v62   ;;  %v1433_v22 = vpack.c.bf16 %v989_v18, %v988_v17  ;;  %v1797_v13 = vpop.eup %1796  ;;  %v928_v57 = vadd.f32 1.0, %v1795_v54 }
 0x195   : > { %1502 = vst [vmem:[%s2321_s24 + $0x68] sm:$0xff] %v1478_v21   ;;  %v1473_v4 = vpack.c.bf16 %v1005_v3, %v1004_v53  ;;  %v1799_v23 = vpop.eup %1798  ;;  %v944_v12 = vadd.f32 1.0, %v1797_v13 }
 0x196   : > { %1493 = vst [vmem:[%s2321_s24 + $0x20] sm:$0xff] %v1433_v22   ;;  %v1801_v14 = vpop.eup %1800  ;;  %1810 = vrcp.f32 %v928_v57  ;;  %v931_v60 = vadd.f32 1.0, %v1799_v23 }
 0x197   : > { %1501 = vst [vmem:[%s2321_s24 + $0x60] sm:$0xff] %v1473_v4   ;;  %v1803_v27 = vpop.eup %1802  ;;  %1812 = vrcp.f32 %v944_v12  ;;  %v947_v42 = vadd.f32 1.0, %v1801_v14 }
 0x198   : > { %v1805_v28 = vpop.eup %1804  ;;  %1814 = vrcp.f32 %v931_v60  ;;  %v929_v37 = vadd.f32 1.0, %v1803_v27 }
 0x199   : > { %1816 = vrcp.f32 %v947_v42  ;;  %v945_v30 = vadd.f32 1.0, %v1805_v28  ;;  %v1807_v19 = vpop.eup %1806 }
 0x19a   : > { %1818 = vrcp.f32 %v929_v37  ;;  %v1809_v33 = vpop.eup %1808  ;;  %v994_v24 = vmul.f32 %v1807_v19, %v2300_v52 }
 0x19b   : > { %1820 = vrcp.f32 %v945_v30  ;;  %v1010_v39 = vmul.f32 %v1809_v33, %v2303_v55 }
 0x1a0   : > { %v1811_v31 = vpop.eup %1810 }
 0x1a1   : > { %v1813_v43 = vpop.eup %1812  ;;  %v992_v47 = vmul.f32 %v1811_v31, %v2336_v58 }
 0x1a2   : > { %v1815_v32 = vpop.eup %1814 }
 0x1a3   : > { %v1817_v44 = vpop.eup %1816  ;;  %v995_v20 = vmul.f32 %v1815_v32, %v2344_v61  ;;  %v1008_v61 = vmul.f32 %v1813_v43, %v2340_v15 }
 0x1a4   : > { %v1819_v36 = vpop.eup %1818  ;;  %v1011_v40 = vmul.f32 %v1817_v44, %v2348_v6 }
 0x1a5   : > { %v1821_v45 = vpop.eup %1820  ;;  %v1448_v48 = vpack.c.bf16 %v995_v20, %v994_v24  ;;  %v993_v52 = vmul.f32 %v1819_v36, %v2353_v11 }
 0x1a6   : > { %v1488_v49 = vpack.c.bf16 %v1011_v40, %v1010_v39  ;;  %v1009_v51 = vmul.f32 %v1821_v45, %v2358_v25 }
 0x1a7   : > { %1496 = vst [vmem:[%s2321_s24 + $0x38] sm:$0xff] %v1448_v48   ;;  %v1443_v55 = vpack.c.bf16 %v993_v52, %v992_v47 }
 0x1a8   : > { %1504 = vst [vmem:[%s2321_s24 + $0x78] sm:$0xff] %v1488_v49   ;;  %v1483_v58 = vpack.c.bf16 %v1009_v51, %v1008_v61 }
 0x1a9   : > { %1495 = vst [vmem:[%s2321_s24 + $0x30] sm:$0xff] %v1443_v55  }
 0x1aa   : > { %1503 = vst [vmem:[%s2321_s24 + $0x70] sm:$0xff] %v1483_v58  }
 0x1ab   : > { %1893 = shalt.err (!%p1890_p5)
}
 0x1ac   : > { %s1894_s6 = scalar_lea.hbm %s2402_s15, 2048  ;;  %s1898_s19 = scalar_lea.hbm %s2459_s3, 4096 }
 0x1ad   : > { %p1895_p9 = scmp.ne.s32.totalorder %s2402_s15, %s1894_s6  ;;  %p1899_p3 = scmp.lt.u32.totalorder %s2402_s15, %s2459_s3 }
 0x1ae   : > { %p1900_p7 = scmp.lt.u32.totalorder %s1898_s19, %s1894_s6  ;;  %p1902_p4 = scmp.lt.u32.totalorder %s1894_s6, %s2402_s15 }
 0x1af   : > { %p1896_p1 = pnand %p1895_p9, %p2094_p10 }
 0x1b0   : > { %p1901_p13 = por %p1900_p7, %p1899_p3 }
 0x1b1   : > { %p1897_p2 = pneg %p1896_p1 }
 0x1b2   : > { %p1903_p6 = por %p1902_p4, %p1901_p13 }
 0x1b4   : > { %p1904_p8 = pnand %p1903_p6, %p1897_p2 }
 0x1b6   : > { %1907 = shalt.err (!%p1904_p8)
}
 0x1b7   : > { %s1973_s24 = smov 64   ;;  %s1974_s10 = smov 4  }
 0x1b8   : > { %1599 = dma.vmem_to_hbm [thread:$0]  (%p2094_p10), %s2404_s11, 2048, %s2402_s15, %s1173_s25, %s1973_s24, %s1973_s24, %s1974_s10  }
 0x1b9 PF: > { %s1202_s9 = sand.u32 1, %s1946_s12   ;;  %p2477_p12 = scmp.ne.s32.totalorder %s2467_s23, 0 }
 0x1ba   : > { %p2478_p11 = scmp.ge.s32.totalorder %s1966_s17, 2  ;;  %s1203_s18 = scalar_lea.sflag [#allocation5], %s1202_s9 }
 0x1bc   : > { %p1610_p0 = pnand %p2478_p11, %p2477_p12 }
 0x1be   : > { %1941 = dma.done.wait (!%p1610_p0), %s1203_s18, 2048  }
 0x1bf   : > { %1943 = vsyncadd (!%p1610_p0), %s1203_s18, 4294965248  ;;  %s20_s17 = sadd.s32 1, %s1966_s17   ;;  %s2479_s12 = smov %s1950_s13 }
 0x1c0   : > { %p17_p5 = scmp.ge.s32.totalorder %s20_s17, 4   ;;  %s2480_s13 = smov %s1954_s14 }
 0x1c1   : > { %s2481_s14 = smov %s2103_s5  ;;  %s2482_s15 = smov %s1962_s16 }
 0x1c2   : > { %s2483_s16 = smov %s2485_s28  ;;  %19 = sbr.rel (!%p17_p5) target bundleno = 7 (0x7), region = 97 }
 0x1c9   :  { %1208 = vsyncpa [#allocation4], 1 }
 0x1ca   :  { %1210 = vsyncpa [#allocation4 + $0x1], 1 }
 0x1cb   :  { %1211 = vsyncpa [#allocation7], 1 }
 0x1cc   :  { %1212 = vsyncpa [#allocation5], 1 }
 0x1cd   :  { %1214 = vsyncpa [#allocation5 + $0x1], 1 }

</bundles_post_ra>
